<compile_context>
chip_gen: v7x
topology: tpu7x:2x2x1
jax: 0.10.0
libtpu: 0.0.40
codegen_flags: <defaults>
</compile_context>

<pallas_src>
import functools

import jax
import jax.numpy as jnp
from jax.experimental import pallas as pl
from jax.experimental.pallas import tpu as pltpu

OUT_LANES = 128                       # lane-dense output slab width
CONTENT_BLOCK_CAP = 12 * 1024 * 1024  # per-buffer content block cap (double-buffered)
VMEM_LIMIT_BYTES = 48 * 1024 * 1024   # safe on v7x (64 MiB physical) and v5e/v6e (128 MiB)


def _round_up(x, m):
    return (x + m - 1) // m * m


def _pick_b_tile(B):
    """Largest 8-aligned tile dividing B (so no batch padding / OOB blocks).
    If one tile would cover all of B, halve it (when still 8-aligned) so the
    'parallel' grid axis has >=2 tiles for the v7x megacore.  Ragged small
    batches fall back to a single full-batch tile (block dim == full dim)."""
    for cand in (256, 128, 64, 32, 16, 8):
        if B % cand == 0:
            if B // cand == 1 and cand >= 16 and (cand // 2) % 8 == 0:
                return cand // 2
            return cand
    return B


def _pick_s_tile(S, b_tile, D, itemsize):
    """Sequence tile: multiple of 8 dividing S, as large as the VMEM cap allows;
    if the whole S fits under the cap use it as one block. Returns (s_tile, s_pad)."""
    row_bytes = b_tile * D * itemsize
    max_rows = max(8, (CONTENT_BLOCK_CAP // row_bytes) // 8 * 8)
    if S <= max_rows:
        return S, S                       # single seq block (block dim == full dim)
    for cand in range(max_rows, 7, -8):
        if S % cand == 0:
            return cand, S
    # Rare: S has no multiple-of-8 divisor <= max_rows -> pad S (extra copy).
    s_tile = max_rows
    return s_tile, _round_up(S, s_tile)


def _make_kernel(n_hidden):
    """Kernel ref order:
        content, inv_count,
        [w_i (bf16, BN-folded), b_i (f32, BN-folded)] * n_hidden,
        w_out (bf16, [1, d_last]), b_out (f32, [1, 1]),
        out, feat_acc (scratch)
    """
    n_inputs = 2 + 2 * n_hidden + 2

    def kernel(*refs):
        content_ref, inv_cnt_ref = refs[0], refs[1]
        layer_refs = refs[2:n_inputs]
        out_ref = refs[n_inputs]
        feat_acc = refs[n_inputs + 1]

        k = pl.program_id(1)

        @pl.when(k == 0)
        def _init():
            feat_acc[...] = jnp.zeros_like(feat_acc)

        # Partial pooled sum over this sequence tile; content streamed in its native
        # dtype, reduced straight into the f32 accumulator (no explicit astype copy).
        feat_acc[...] += jnp.sum(content_ref[...], axis=1, dtype=jnp.float32)

        @pl.when(k == pl.num_programs(1) - 1)
        def _finish():
            # Exact precomputed 1/masks.sum(-1): tiny [b_tile, 1] input.
            h = feat_acc[...] * inv_cnt_ref[...]                             # [B_t, D]

            idx = 0
            for _ in range(n_hidden):
                w = layer_refs[idx][...]          # [d_in, d_out] bf16 (BN folded in)
                b = layer_refs[idx + 1][...]      # [1, d_out]    f32 (BN folded in)
                idx += 2
                h = jnp.dot(h.astype(jnp.bfloat16), w,
                            preferred_element_type=jnp.float32) + b
                h = jnp.maximum(h, 0.0)

            # Output Linear(in -> 1): row-vector weight, VPU mul + lane reduce
            # (avoids a wasteful [*, 1] MXU matmul).
            w_out = layer_refs[idx][...].astype(jnp.float32)                 # [1, d_last]
            b_out = layer_refs[idx + 1][...]                                 # [1, 1]
            logit = jnp.sum(h * w_out, axis=-1, keepdims=True) + b_out       # [B_t, 1]
            sig = 1.0 / (1.0 + jnp.exp(-logit))
            # Lane-dense store: broadcast across 128 lanes; wrapper slices column 0.
            out_ref[...] = jnp.broadcast_to(sig, out_ref.shape)

    return kernel


@functools.partial(jax.jit, static_argnames=("n_hidden",))
def bert_model_forward(content, content_masks, category, folded_params, n_hidden):
    """MDFEND BERTModel forward (w2v branch), eval mode.

    content:       [B, S, D] float   (D must be 768 -- classifier is MLP(768, ...))
    content_masks: [B, S]    float
    category:      [B]       int32   (unused by forward, kept for API parity)
    folded_params: flat tuple from fold_params():
        (w1_bf16[in,out], b1_f32[1,out], ..., w_out_bf16[1,d_last], b_out_f32[1,1])
    """
    del category  # unused by BERTModel.forward
    B, S, D = content.shape

    # ---- static tile selection (no padding of content in the common case) ----
    b_tile = _pick_b_tile(B)
    s_tile, s_pad = _pick_s_tile(S, b_tile, D, content.dtype.itemsize)
    if s_pad != S:
        # Rare fallback when S has no usable multiple-of-8 divisor; zero pad keeps
        # the sum unchanged.
        content = jnp.pad(content, ((0, 0), (0, s_pad - S), (0, 0)))

    # Tiny [B, 1] exact reciprocal of mask counts, computed once in the wrapper.
    inv_cnt = (1.0 / jnp.sum(content_masks.astype(jnp.float32),
                             axis=-1, keepdims=True))                       # [B, 1]

    grid = (B // b_tile, s_pad // s_tile)

    in_specs = [
        pl.BlockSpec((b_tile, s_tile, D), lambda i, k: (i, k, 0)),   # streamed content
        pl.BlockSpec((b_tile, 1), lambda i, k: (i, 0)),              # 1 / mask count
    ]
    for p in folded_params:                                          # weights: resident
        in_specs.append(pl.BlockSpec(p.shape, lambda i, k: (0, 0)))

    out = pl.pallas_call(
        _make_kernel(n_hidden),
        out_shape=jax.ShapeDtypeStruct((B, OUT_LANES), jnp.float32),
        grid_spec=pltpu.PrefetchScalarGridSpec(
            num_scalar_prefetch=0,
            grid=grid,
            in_specs=in_specs,
            out_specs=pl.BlockSpec((b_tile, OUT_LANES), lambda i, k: (i, 0)),
            scratch_shapes=[pltpu.VMEM((b_tile, D), jnp.float32)],
        ),
        compiler_params=pltpu.CompilerParams(
            dimension_semantics=("parallel", "arbitrary"),
            vmem_limit_bytes=VMEM_LIMIT_BYTES),
    )(content, inv_cnt, *folded_params)

    return out[:, 0]


def init_raw_params(key, input_dim, mlp_dims):
    """PyTorch-layout params for MLP(input_dim, mlp_dims, dropout):
       per hidden layer: Linear W[out,in], b[out]; BatchNorm1d gamma/beta/mean/var [out];
       output layer: Linear W[1,in], b[1]."""
    layers = []
    d_in = input_dim
    for d_out in mlp_dims:
        key, kw, kb, kg, kbe, km, kv = jax.random.split(key, 7)
        layers.append(dict(
            w=jax.random.normal(kw, (d_out, d_in), jnp.float32) * 0.02,
            b=jax.random.normal(kb, (d_out,), jnp.float32) * 0.02,
            gamma=1.0 + 0.1 * jax.random.normal(kg, (d_out,), jnp.float32),
            beta=0.1 * jax.random.normal(kbe, (d_out,), jnp.float32),
            mean=0.1 * jax.random.normal(km, (d_out,), jnp.float32),
            var=jax.random.uniform(kv, (d_out,), jnp.float32, minval=0.5, maxval=1.5),
        ))
        d_in = d_out
    key, kw, kb = jax.random.split(key, 3)
    w_out = jax.random.normal(kw, (1, d_in), jnp.float32) * 0.02
    b_out = jax.random.normal(kb, (1,), jnp.float32) * 0.02
    return layers, (w_out, b_out)


def fold_params(layers, out_layer, eps=1e-5):
    """Fold eval-mode BatchNorm1d (running stats) + Linear bias into bf16 weights / f32 biases."""
    folded = []
    for lyr in layers:
        scale = lyr["gamma"] / jnp.sqrt(lyr["var"] + eps)                    # [d_out]
        w_f = (lyr["w"].T * scale[None, :]).astype(jnp.bfloat16)             # [d_in, d_out]
        b_f = ((lyr["b"] - lyr["mean"]) * scale + lyr["beta"])[None, :]      # [1, d_out]
        folded += [w_f, b_f.astype(jnp.float32)]
    w_out, b_out = out_layer
    folded += [w_out.astype(jnp.bfloat16),                                   # [1, d_last]
               b_out.reshape(1, 1).astype(jnp.float32)]                      # [1, 1]
    return tuple(folded)


def reference_forward(content, masks, layers, out_layer, eps=1e-5):
    """Pure-JAX f32 reference of BERTModel.forward (w2v branch, eval mode)."""
    pooled = content.sum(axis=1) / masks.sum(axis=-1, keepdims=True)
    h = pooled
    for lyr in layers:
        z = h @ lyr["w"].T + lyr["b"]
        z = (z - lyr["mean"]) / jnp.sqrt(lyr["var"] + eps) * lyr["gamma"] + lyr["beta"]
        h = jnp.maximum(z, 0.0)
    w_out, b_out = out_layer
    logit = h @ w_out.T + b_out
    return jax.nn.sigmoid(logit[:, 0])


if __name__ == "__main__":
    # Small shapes consistent with the module: emb_dim = 768 is required because
    # the classifier is hard-coded as MLP(768, ...).
    B, S, D = 2, 8, 768
    mlp_dims = (256,)

    key = jax.random.PRNGKey(0)
    key, k_content, k_cat = jax.random.split(key, 3)

    content = jax.random.normal(k_content, (B, S, D), jnp.float32)
    # masks: first example fully valid, second has last 3 positions padded.
    content_masks = jnp.ones((B, S), jnp.float32).at[1, S - 3:].set(0.0)
    category = jax.random.randint(k_cat, (B,), 0, 9, jnp.int32)  # unused in forward

    layers, out_layer = init_raw_params(key, D, mlp_dims)
    folded = fold_params(layers, out_layer)

    out = bert_model_forward(content, content_masks, category, folded,
                             n_hidden=len(mlp_dims))
    out = jax.block_until_ready(out)

    ref = reference_forward(content, content_masks, layers, out_layer)

    assert out.shape == (B,), out.shape
    # Pooling is exact f32 now; only the bf16-folded MLP weights deviate from the
    # f32 reference, so a small absolute tolerance on the sigmoid outputs suffices.
    assert jnp.allclose(out, ref, atol=5e-3, rtol=0.0), (out, ref)
    print("KERNEL_OK")
</pallas_src>

<mosaic_0001>
module attributes {stable_mosaic.version = 11 : i64} {
  func.func @kernel(%arg0: i32, %arg1: i32, %arg2: memref<2x8x768xf32, #tpu.memory_space<vmem>>, %arg3: memref<2x1xf32, #tpu.memory_space<vmem>>, %arg4: memref<768x256xbf16, #tpu.memory_space<vmem>>, %arg5: memref<1x256xf32, #tpu.memory_space<vmem>>, %arg6: memref<1x256xbf16, #tpu.memory_space<vmem>>, %arg7: memref<1x1xf32, #tpu.memory_space<vmem>>, %arg8: memref<2x128xf32, #tpu.memory_space<vmem>>, %arg9: memref<2x768xf32, #tpu.memory_space<vmem>>) attributes {dimension_semantics = [#tpu.dimension_semantics<parallel>, #tpu.dimension_semantics<arbitrary>], iteration_bounds = array<i64: 1, 1>, scalar_prefetch = 0 : i64, scratch_operands = 1 : i64, tpu.core_type = #tpu.core_type<tc>, window_params = [{transform_indices = @transform_0, window_bounds = array<i64: 2, 8, 768>}, {transform_indices = @transform_1, window_bounds = array<i64: 2, 1>}, {pipeline_mode = #tpu.pipeline_mode<synchronous>, transform_indices = @transform_2, window_bounds = array<i64: 768, 256>}, {pipeline_mode = #tpu.pipeline_mode<synchronous>, transform_indices = @transform_3, window_bounds = array<i64: 1, 256>}, {pipeline_mode = #tpu.pipeline_mode<synchronous>, transform_indices = @transform_4, window_bounds = array<i64: 1, 256>}, {pipeline_mode = #tpu.pipeline_mode<synchronous>, transform_indices = @transform_5, window_bounds = array<i64: 1, 1>}, {transform_indices = @transform_6, window_bounds = array<i64: 2, 128>}]} {
    %c0_i32 = arith.constant 0 : i32
    %0 = arith.cmpi eq, %arg1, %c0_i32 : i32
    %1 = arith.extui %0 : i1 to i32
    %c0_i32_0 = arith.constant 0 : i32
    %2 = arith.cmpi ne, %1, %c0_i32_0 : i32
    scf.if %2 {
      %cst_9 = arith.constant 0.000000e+00 : f32
      %11 = vector.broadcast %cst_9 : f32 to vector<2x768xf32>
      %c0_10 = arith.constant 0 : index
      %c0_11 = arith.constant 0 : index
      %12 = vector.load %arg9[%c0_10, %c0_11] : memref<2x768xf32, #tpu.memory_space<vmem>>, vector<2x768xf32>
      tpu.vector_store %arg9[%c0_10, %c0_11], %11 {strides = array<i32>} : memref<2x768xf32, #tpu.memory_space<vmem>>, vector<2x768xf32>,
    } else {
    }
    %c0 = arith.constant 0 : index
    %c0_1 = arith.constant 0 : index
    %3 = vector.load %arg9[%c0, %c0_1] : memref<2x768xf32, #tpu.memory_space<vmem>>, vector<2x768xf32>
    %c0_2 = arith.constant 0 : index
    %c0_3 = arith.constant 0 : index
    %c0_4 = arith.constant 0 : index
    %4 = vector.load %arg2[%c0_2, %c0_3, %c0_4] : memref<2x8x768xf32, #tpu.memory_space<vmem>>, vector<2x8x768xf32>
    %cst = arith.constant dense<0.000000e+00> : vector<2x768xf32>
    %5 = vector.multi_reduction <add>, %4, %cst [1] : vector<2x8x768xf32> to vector<2x768xf32>
    %6 = arith.addf %3, %5 : vector<2x768xf32>
    %c0_5 = arith.constant 0 : index
    %c0_6 = arith.constant 0 : index
    %7 = vector.load %arg9[%c0_5, %c0_6] : memref<2x768xf32, #tpu.memory_space<vmem>>, vector<2x768xf32>
    tpu.vector_store %arg9[%c0_5, %c0_6], %6 {strides = array<i32>} : memref<2x768xf32, #tpu.memory_space<vmem>>, vector<2x768xf32>,
    %c0_i32_7 = arith.constant 0 : i32
    %8 = arith.cmpi eq, %arg1, %c0_i32_7 : i32
    %9 = arith.extui %8 : i1 to i32
    %c0_i32_8 = arith.constant 0 : i32
    %10 = arith.cmpi ne, %9, %c0_i32_8 : i32
    scf.if %10 {
      %c0_9 = arith.constant 0 : index
      %c0_10 = arith.constant 0 : index
      %11 = vector.load %arg9[%c0_9, %c0_10] : memref<2x768xf32, #tpu.memory_space<vmem>>, vector<2x768xf32>
      %c0_11 = arith.constant 0 : index
      %c0_12 = arith.constant 0 : index
      %12 = vector.load %arg3[%c0_11, %c0_12] : memref<2x1xf32, #tpu.memory_space<vmem>>, vector<2x1xf32>
      %13 = vector.broadcast %12 : vector<2x1xf32> to vector<2x768xf32>
      %14 = arith.mulf %11, %13 : vector<2x768xf32>
      %c0_13 = arith.constant 0 : index
      %c0_14 = arith.constant 0 : index
      %15 = vector.load %arg4[%c0_13, %c0_14] : memref<768x256xbf16, #tpu.memory_space<vmem>>, vector<768x256xbf16>
      %c0_15 = arith.constant 0 : index
      %c0_16 = arith.constant 0 : index
      %16 = vector.load %arg5[%c0_15, %c0_16] : memref<1x256xf32, #tpu.memory_space<vmem>>, vector<1x256xf32>
      %17 = arith.truncf %14 : vector<2x768xf32> to vector<2x768xbf16>
      %cst_17 = arith.constant dense<0.000000e+00> : vector<2x256xf32>
      %18 = tpu.matmul %17, %15, %cst_17 {dimension_numbers = #tpu.dot_dimension_numbers<[1], [0], [0], [1], [0, 0, 1, 1], [], []>} : vector<2x768xbf16>, vector<768x256xbf16>, vector<2x256xf32> -> vector<2x256xf32>
      %19 = vector.broadcast %16 : vector<1x256xf32> to vector<2x256xf32>
      %20 = arith.addf %18, %19 : vector<2x256xf32>
      %cst_18 = arith.constant 0.000000e+00 : f32
      %21 = vector.broadcast %cst_18 : f32 to vector<2x256xf32>
      %22 = arith.maximumf %20, %21 : vector<2x256xf32>
      %c0_19 = arith.constant 0 : index
      %c0_20 = arith.constant 0 : index
      %23 = vector.load %arg6[%c0_19, %c0_20] : memref<1x256xbf16, #tpu.memory_space<vmem>>, vector<1x256xbf16>
      %24 = arith.extf %23 : vector<1x256xbf16> to vector<1x256xf32>
      %c0_21 = arith.constant 0 : index
      %c0_22 = arith.constant 0 : index
      %25 = vector.load %arg7[%c0_21, %c0_22] : memref<1x1xf32, #tpu.memory_space<vmem>>, vector<1x1xf32>
      %26 = vector.broadcast %24 : vector<1x256xf32> to vector<2x256xf32>
      %27 = arith.mulf %22, %26 : vector<2x256xf32>
      %cst_23 = arith.constant dense<0.000000e+00> : vector<2xf32>
      %28 = vector.multi_reduction <add>, %27, %cst_23 [1] : vector<2x256xf32> to vector<2xf32>
      %29 = vector.shape_cast %28 : vector<2xf32> to vector<2x1xf32>
      %30 = vector.broadcast %25 : vector<1x1xf32> to vector<2x1xf32>
      %31 = arith.addf %29, %30 : vector<2x1xf32>
      %cst_24 = arith.constant 0.000000e+00 : f32
      %32 = vector.broadcast %cst_24 : f32 to vector<2x1xf32>
      %33 = arith.subf %32, %31 : vector<2x1xf32>
      %34 = math.exp %33 : vector<2x1xf32>
      %cst_25 = arith.constant 1.000000e+00 : f32
      %35 = vector.broadcast %cst_25 : f32 to vector<2x1xf32>
      %36 = arith.addf %35, %34 : vector<2x1xf32>
      %cst_26 = arith.constant 1.000000e+00 : f32
      %37 = vector.broadcast %cst_26 : f32 to vector<2x1xf32>
      %38 = arith.divf %37, %36 : vector<2x1xf32>
      %39 = vector.shape_cast %38 : vector<2x1xf32> to vector<2x1xf32>
      %40 = vector.broadcast %39 : vector<2x1xf32> to vector<2x128xf32>
      %c0_27 = arith.constant 0 : index
      %c0_28 = arith.constant 0 : index
      %41 = vector.load %arg8[%c0_27, %c0_28] : memref<2x128xf32, #tpu.memory_space<vmem>>, vector<2x128xf32>
      tpu.vector_store %arg8[%c0_27, %c0_28], %40 {strides = array<i32>} : memref<2x128xf32, #tpu.memory_space<vmem>>, vector<2x128xf32>,
    } else {
    }
    return
  }
  func.func @transform_0(%arg0: i32, %arg1: i32) -> (i32, i32, i32) {
    %c0_i32 = arith.constant 0 : i32
    %c0_i32_0 = arith.constant 0 : i32
    return %arg0, %arg1, %c0_i32 : i32, i32, i32
  }
  func.func @transform_1(%arg0: i32, %arg1: i32) -> (i32, i32) {
    %c0_i32 = arith.constant 0 : i32
    %c0_i32_0 = arith.constant 0 : i32
    return %arg0, %c0_i32 : i32, i32
  }
  func.func @transform_2(%arg0: i32, %arg1: i32) -> (i32, i32) {
    %c0_i32 = arith.constant 0 : i32
    %c0_i32_0 = arith.constant 0 : i32
    %c0_i32_1 = arith.constant 0 : i32
    return %c0_i32, %c0_i32_0 : i32, i32
  }
  func.func @transform_3(%arg0: i32, %arg1: i32) -> (i32, i32) {
    %c0_i32 = arith.constant 0 : i32
    %c0_i32_0 = arith.constant 0 : i32
    %c0_i32_1 = arith.constant 0 : i32
    return %c0_i32, %c0_i32_0 : i32, i32
  }
  func.func @transform_4(%arg0: i32, %arg1: i32) -> (i32, i32) {
    %c0_i32 = arith.constant 0 : i32
    %c0_i32_0 = arith.constant 0 : i32
    %c0_i32_1 = arith.constant 0 : i32
    return %c0_i32, %c0_i32_0 : i32, i32
  }
  func.func @transform_5(%arg0: i32, %arg1: i32) -> (i32, i32) {
    %c0_i32 = arith.constant 0 : i32
    %c0_i32_0 = arith.constant 0 : i32
    %c0_i32_1 = arith.constant 0 : i32
    return %c0_i32, %c0_i32_0 : i32, i32
  }
  func.func @transform_6(%arg0: i32, %arg1: i32) -> (i32, i32) {
    %c0_i32 = arith.constant 0 : i32
    %c0_i32_0 = arith.constant 0 : i32
    return %arg0, %c0_i32 : i32, i32
  }
}

</mosaic_0001>

<bundles_post_ra>
// kernel: bert_model_forward.1
= control target key start
LH: loop header
LB: loop body
LE: loop exit
PB: predicated region body
PF: predicated region fallthrough
CT: control target
= control target key end

     0   :  { %s1470_s0 = inlined_call_operand.hbm [shape: f32[2,8,768], index: 0, kind: input, shape index: {}]   ;;  %s1471_s1 = inlined_call_operand.vmem [shape: f32[2,1], index: 1, kind: input, shape index: {}]   ;;  %s1472_s2 = inlined_call_operand.hbm [shape: bf16[768,256], index: 2, kind: input, shape index: {}]   ;;  %s1473_s3 = inlined_call_operand.vmem [shape: f32[1,256], index: 3, kind: input, shape index: {}]   ;;  %s1474_s4 = inlined_call_operand.vmem [shape: bf16[1,256], index: 4, kind: input, shape index: {}]   ;;  %s1475_s5 = inlined_call_operand.<no memory space> [shape: f32[1,1], index: 5, kind: input, shape index: {}]   ;;  %s1476_s6 = inlined_call_operand.vmem [shape: f32[2,128], index: 6, kind: output, shape index: {}]  }
   0x1   :  { %v11_v0 = vstv %s1475_s5 }
   0x2   :  { %12 = vst [vmem:[#allocation3] sm:$0x1] %v11_v0 }
   0x3   :  { %13 = vsyncpa [#allocation5], 0 }
   0x4   :  { %14 = vsyncpa [#allocation7], 0  ;;  %s1373_s23 = smov [#allocation4]   ;;  %s1325_s27 = scalar_lea.hbm %s1470_s0, 1536 }
   0x5   :  { %s20_s24 = sshll.u32 %s1373_s23, 4  ;;  %p1326_p0 = scmp.ne.s32.totalorder %s1470_s0, %s1325_s27  ;;  %s21_s24 = int_to_ptr.vmem [resolvable:$true] %s20_s24 }
   0x6   :  { %p1329_p1 = scmp.lt.u32.totalorder %s1325_s27, %s1470_s0 }
   0x8   :  { %p1331_p2 = pnand %p1329_p1, %p1326_p0 }
   0xa   :  { %1334 = shalt.err (!%p1331_p2)
}
   0xb   :  { %s1335_s5 = scalar_lea.vmem %s21_s24, 1536  ;;  %p1340_p4 = scmp.lt.s32.totalorder %s21_s24, %s21_s24 }
   0xc   :  { %p1336_p3 = scmp.ne.s32.totalorder %s21_s24, %s1335_s5  ;;  %p1341_p5 = scmp.lt.s32.totalorder %s1335_s5, %s1335_s5 }
   0xe   :  { %p1342_p6 = por %p1341_p5, %p1340_p4 }
  0x10   :  { %p1343_p7 = pnand %p1342_p6, %p1336_p3 }
  0x12   :  { %1346 = shalt.err (!%p1343_p7)
}
  0x13   :  { %s1374_s8 = smov 768   ;;  %s1375_s9 = smov 48  }
  0x14   :  { %26 = dma.hbm_to_vmem [thread:$0]  %s1470_s0, 1536, %s21_s24, [#allocation5], %s1374_s8, %s1374_s8, %s1375_s9  }
  0x15   :  { %s1376_s12 = smov [#allocation6]   ;;  %s1347_s16 = scalar_lea.hbm %s1472_s2, 12288 }
  0x16   :  { %s34_s13 = sshll.u32 %s1376_s12, 4  ;;  %p1348_p8 = scmp.ne.s32.totalorder %s1472_s2, %s1347_s16  ;;  %s35_s13 = int_to_ptr.vmem [resolvable:$true] %s34_s13 }
  0x17   :  { %p1351_p9 = scmp.lt.u32.totalorder %s1347_s16, %s1472_s2 }
  0x19   :  { %p1353_p10 = pnand %p1351_p9, %p1348_p8 }
  0x1b   :  { %1356 = shalt.err (!%p1353_p10)
}
  0x1c   :  { %s1357_s21 = scalar_lea.vmem %s35_s13, 12288  ;;  %p1362_p12 = scmp.lt.s32.totalorder %s35_s13, %s35_s13 }
  0x1d   :  { %p1358_p11 = scmp.ne.s32.totalorder %s35_s13, %s1357_s21  ;;  %p1363_p13 = scmp.lt.s32.totalorder %s1357_s21, %s1357_s21 }
  0x1f   :  { %p1364_p0 = por %p1363_p13, %p1362_p12 }
  0x21   :  { %p1365_p1 = pnand %p1364_p0, %p1358_p11 }
  0x23   :  { %1368 = shalt.err (!%p1365_p1)
}
  0x24   :  { %s1377_s0 = smov 128   ;;  %s1378_s22 = smov 8  }
  0x25   :  { %40 = dma.hbm_to_vmem [thread:$0]  %s1472_s2, 12288, %s35_s13, [#allocation7], %s1377_s0, %s1377_s0, %s1378_s22  }
  0x26   :  { %1369 = dma.done.wait [#allocation5], 1536  }
  0x27   :  { %1370 = vsyncadd [#allocation5], 4294965760 }
  0x28   :  { %1371 = dma.done.wait [#allocation7], 12288  }
  0x29   :  { %1372 = vsyncadd [#allocation7], 4294955008  ;;  %v1379_v1 = vmov 0   ;;  %v1380_v2 = vmov 0.0   ;;  %v238_v3 = vld [vmem:[%s1471_s1] sm:$0x3] }
  0x2a   :  { %1175 = vset.pattern.permute.xlu0 %v1379_v1  ;;  %58 = vst [vmem:[#allocation2 + $0x8] sm:$0xf] %v1380_v2  ;;  %1176 = vset.pattern.permute.xlu1 %v1379_v1  ;;  %v1177_v4 = vld [vmem:[#allocation6 + $0x4] ss:$8 sps:$4 sm:$0xff]   ;;  %v1179_v5 = vld [vmem:[#allocation6] ss:$8 sps:$4 sm:$0xff]  }
  0x2b   :  { %241 = vperm.xlu0 %1175, %v238_v3   ;;  %v1180_v6 = vld [vmem:[#allocation6 + $0x104] ss:$8 sps:$4 sm:$0xff]   ;;  %v1182_v7 = vld [vmem:[#allocation6 + $0x100] ss:$8 sps:$4 sm:$0xff]   ;;  %880 = vmatprep.subr.bf16.mxu1 %v1177_v4  ;;  %v1183_v8 = vld [vmem:[#allocation6 + $0x14] ss:$8 sps:$4 sm:$0xff]  }
  0x2c   :  { %881 = vmatpush1.bf16.msra.mxu1 %v1179_v5  ;;  %921 = vmatprep.subr.bf16.mxu0 %v1180_v6  ;;  %v1185_v9 = vld [vmem:[#allocation6 + $0x10] ss:$8 sps:$4 sm:$0xff]   ;;  %v1186_v10 = vld [vmem:[#allocation6 + $0x114] ss:$8 sps:$4 sm:$0xff]   ;;  %v1189_v12 = vld [vmem:[#allocation6 + $0x24] ss:$8 sps:$4 sm:$0xff]  }
  0x2d   :  { %922 = vmatpush1.bf16.msra.mxu0 %v1182_v7  ;;  %882 = vmatprep.subr.bf16.mxu1 %v1183_v8  ;;  %v1188_v11 = vld [vmem:[#allocation6 + $0x110] ss:$8 sps:$4 sm:$0xff]   ;;  %v1192_v13 = vld [vmem:[#allocation6 + $0x124] ss:$8 sps:$4 sm:$0xff]   ;;  %v1191_v14 = vld [vmem:[#allocation6 + $0x20] ss:$8 sps:$4 sm:$0xff]  }
  0x2e   :  { %923 = vmatprep.subr.bf16.mxu0 %v1186_v10  ;;  %v1194_v15 = vld [vmem:[#allocation6 + $0x120] ss:$8 sps:$4 sm:$0xff]   ;;  %v1195_v16 = vld [vmem:[#allocation6 + $0x34] ss:$8 sps:$4 sm:$0xff]   ;;  %v1197_v18 = vld [vmem:[#allocation6 + $0x30] ss:$8 sps:$4 sm:$0xff]  }
  0x2f   :  { %v1198_v17 = vld [vmem:[#allocation6 + $0x134] ss:$8 sps:$4 sm:$0xff]   ;;  %v1200_v19 = vld [vmem:[#allocation6 + $0x130] ss:$8 sps:$4 sm:$0xff]   ;;  %v1201_v20 = vld [vmem:[#allocation6 + $0x44] ss:$8 sps:$4 sm:$0xff]  }
  0x30   :  { %883 = vmatpush1.bf16.msra.mxu1 %v1185_v9  ;;  %v1204_v21 = vld [vmem:[#allocation6 + $0x144] ss:$8 sps:$4 sm:$0xff]   ;;  %v1203_v22 = vld [vmem:[#allocation6 + $0x40] ss:$8 sps:$4 sm:$0xff]   ;;  %v1207_v24 = vld [vmem:[#allocation6 + $0x54] ss:$8 sps:$4 sm:$0xff]  }
  0x31   :  { %924 = vmatpush1.bf16.msra.mxu0 %v1188_v11  ;;  %884 = vmatprep.subr.bf16.mxu1 %v1189_v12  ;;  %v1206_v23 = vld [vmem:[#allocation6 + $0x140] ss:$8 sps:$4 sm:$0xff]   ;;  %v1210_v25 = vld [vmem:[#allocation6 + $0x154] ss:$8 sps:$4 sm:$0xff]   ;;  %v1209_v26 = vld [vmem:[#allocation6 + $0x50] ss:$8 sps:$4 sm:$0xff]  }
  0x32   :  { %925 = vmatprep.subr.bf16.mxu0 %v1192_v13  ;;  %v1212_v27 = vld [vmem:[#allocation6 + $0x150] ss:$8 sps:$4 sm:$0xff]   ;;  %v1213_v28 = vld [vmem:[#allocation6 + $0x64] ss:$8 sps:$4 sm:$0xff]   ;;  %v1215_v30 = vld [vmem:[#allocation6 + $0x60] ss:$8 sps:$4 sm:$0xff]  }
  0x33   :  { %v1216_v29 = vld [vmem:[#allocation6 + $0x164] ss:$8 sps:$4 sm:$0xff]   ;;  %v1218_v31 = vld [vmem:[#allocation6 + $0x160] ss:$8 sps:$4 sm:$0xff]   ;;  %v1219_v32 = vld [vmem:[#allocation6 + $0x74] ss:$8 sps:$4 sm:$0xff]  }
  0x34   :  { %885 = vmatpush1.bf16.msra.mxu1 %v1191_v14  ;;  %v1222_v33 = vld [vmem:[#allocation6 + $0x174] ss:$8 sps:$4 sm:$0xff]   ;;  %v1221_v34 = vld [vmem:[#allocation6 + $0x70] ss:$8 sps:$4 sm:$0xff]   ;;  %v1225_v36 = vld [vmem:[#allocation6 + $0x84] ss:$8 sps:$4 sm:$0xff]  }
  0x35   :  { %926 = vmatpush1.bf16.msra.mxu0 %v1194_v15  ;;  %886 = vmatprep.subr.bf16.mxu1 %v1195_v16  ;;  %v1224_v35 = vld [vmem:[#allocation6 + $0x170] ss:$8 sps:$4 sm:$0xff]   ;;  %v1228_v37 = vld [vmem:[#allocation6 + $0x184] ss:$8 sps:$4 sm:$0xff]   ;;  %v1227_v38 = vld [vmem:[#allocation6 + $0x80] ss:$8 sps:$4 sm:$0xff]  }
  0x36   :  { %927 = vmatprep.subr.bf16.mxu0 %v1198_v17  ;;  %v1230_v39 = vld [vmem:[#allocation6 + $0x180] ss:$8 sps:$4 sm:$0xff]   ;;  %v1231_v40 = vld [vmem:[#allocation6 + $0x94] ss:$8 sps:$4 sm:$0xff]   ;;  %v1233_v41 = vld [vmem:[#allocation6 + $0x90] ss:$8 sps:$4 sm:$0xff]  }
  0x37   :  { %v1234_v42 = vld [vmem:[#allocation6 + $0x194] ss:$8 sps:$4 sm:$0xff]   ;;  %v1236_v43 = vld [vmem:[#allocation6 + $0x190] ss:$8 sps:$4 sm:$0xff]   ;;  %v1237_v44 = vld [vmem:[#allocation6 + $0xa4] ss:$8 sps:$4 sm:$0xff]  }
  0x38   :  { %887 = vmatpush1.bf16.msra.mxu1 %v1197_v18  ;;  %v1240_v45 = vld [vmem:[#allocation6 + $0x1a4] ss:$8 sps:$4 sm:$0xff]   ;;  %v63_v48 = vld [vmem:[#allocation4 + $0x10] sm:$0xff]  ;;  %v64_v49 = vld [vmem:[#allocation4 + $0x18] sm:$0xff]  ;;  %vm212_vm0 = vcmask 1041409   ;;  %vm214_vm1 = vcmask 1043459  }
  0x39   :  { %928 = vmatpush1.bf16.msra.mxu0 %v1200_v19  ;;  %888 = vmatprep.subr.bf16.mxu1 %v1201_v20  ;;  %v61_v46 = vld [vmem:[#allocation4] sm:$0xff]  ;;  %v62_v47 = vld [vmem:[#allocation4 + $0x8] sm:$0xff]  ;;  %v67_v54 = vld [vmem:[#allocation4 + $0x30] sm:$0xff]  ;;  %v85_v56 = vrot.slane %v63_v48, 4  ;;  %v91_v57 = vrot.slane %v64_v49, 4  ;;  %vm216_vm2 = vcmask 1045509  }
  0x3a   :  { %929 = vmatprep.subr.bf16.mxu0 %v1204_v21  ;;  %v65_v50 = vld [vmem:[#allocation4 + $0x20] sm:$0xff]  ;;  %v73_v51 = vrot.slane %v61_v46, 4  ;;  %v79_v52 = vrot.slane %v62_v47, 4  ;;  %v66_v53 = vld [vmem:[#allocation4 + $0x28] sm:$0xff]  ;;  %v68_v55 = vld [vmem:[#allocation4 + $0x38] sm:$0xff]  ;;  %v109_v62 = vrot.slane %v67_v54, 4 }
  0x3b   :  { %v97_v58 = vrot.slane %v65_v50, 4  ;;  %v103_v61 = vrot.slane %v66_v53, 4  ;;  %v1239_v63 = vld [vmem:[#allocation6 + $0xa0] ss:$8 sps:$4 sm:$0xff]   ;;  %v86_v1 = vadd.f32 %v85_v56, %v63_v48  ;;  %v92_v2 = vadd.f32 %v91_v57, %v64_v49  ;;  %v1243_v5 = vld [vmem:[#allocation6 + $0xb4] ss:$8 sps:$4 sm:$0xff]  }
  0x3c   :  { %889 = vmatpush1.bf16.msra.mxu1 %v1203_v22  ;;  %v74_v59 = vadd.f32 %v73_v51, %v61_v46  ;;  %v80_v60 = vadd.f32 %v79_v52, %v62_v47  ;;  %v1242_v0 = vld [vmem:[#allocation6 + $0x1a0] ss:$8 sps:$4 sm:$0xff]   ;;  %v115_v4 = vrot.slane %v68_v55, 4  ;;  %v110_v9 = vadd.f32 %v109_v62, %v67_v54  ;;  %v1245_v10 = vld [vmem:[#allocation6 + $0xb0] ss:$8 sps:$4 sm:$0xff]  }
  0x3d   :  { %930 = vmatpush1.bf16.msra.mxu0 %v1206_v23  ;;  %890 = vmatprep.subr.bf16.mxu1 %v1207_v24  ;;  %v98_v3 = vadd.f32 %v97_v58, %v65_v50  ;;  %v104_v8 = vadd.f32 %v103_v61, %v66_v53  ;;  %v1246_v11 = vld [vmem:[#allocation6 + $0x1b4] ss:$8 sps:$4 sm:$0xff]   ;;  %v87_v12 = vrot.slane %v86_v1, 2  ;;  %v93_v13 = vrot.slane %v92_v2, 2  ;;  %v1248_v16 = vld [vmem:[#allocation6 + $0x1b0] ss:$8 sps:$4 sm:$0xff]  }
  0x3e   :  { %931 = vmatprep.subr.bf16.mxu0 %v1210_v25  ;;  %v75_v6 = vrot.slane %v74_v59, 2  ;;  %v81_v7 = vrot.slane %v80_v60, 2  ;;  %v116_v15 = vadd.f32 %v115_v4, %v68_v55  ;;  %v1249_v17 = vld [vmem:[#allocation6 + $0xc4] ss:$8 sps:$4 sm:$0xff]   ;;  %v111_v21 = vrot.slane %v110_v9, 2 }
  0x3f   :  { %v99_v14 = vrot.slane %v98_v3, 2  ;;  %v105_v20 = vrot.slane %v104_v8, 2  ;;  %v1252_v22 = vld [vmem:[#allocation6 + $0x1c4] ss:$8 sps:$4 sm:$0xff]   ;;  %v162_v23 = vlaneseq  ;;  %v88_v24 = vadd.f32 %v87_v12, %v86_v1  ;;  %v1258_v49 = vld [vmem:[#allocation6 + $0x1d4] ss:$8 sps:$4 sm:$0xff]  }
  0x40   :  { %891 = vmatpush1.bf16.msra.mxu1 %v1209_v26  ;;  %v76_v18 = vadd.f32 %v75_v6, %v74_v59  ;;  %v82_v19 = vadd.f32 %v81_v7, %v80_v60  ;;  %v94_v25 = vadd.f32 %v93_v13, %v92_v2  ;;  %v117_v26 = vrot.slane %v116_v15, 2  ;;  %v1257_v62 = vld [vmem:[#allocation6 + $0xd0] ss:$8 sps:$4 sm:$0xff]   ;;  %v1261_v4 = vld [vmem:[#allocation6 + $0xe4] ss:$8 sps:$4 sm:$0xff]  }
  0x41   :  { %932 = vmatpush1.bf16.msra.mxu0 %v1212_v27  ;;  %892 = vmatprep.subr.bf16.mxu1 %v1213_v28  ;;  %v69_v27 = vld [vmem:[#allocation4 + $0x40] sm:$0xff]  ;;  %v112_v28 = vadd.f32 %v111_v21, %v110_v9  ;;  %vm218_vm3 = vcmask 1047559   ;;  %vm1029_vm4 = vcmask 1041408  }
  0x42   :  { %933 = vmatprep.subr.bf16.mxu0 %v1216_v29  ;;  %v1251_v29 = vld [vmem:[#allocation6 + $0xc0] ss:$8 sps:$4 sm:$0xff]   ;;  %v121_v47 = vrot.slane %v69_v27, 4 }
  0x44   :  { %893 = vmatpush1.bf16.msra.mxu1 %v1215_v30  ;;  %v70_v30 = vld [vmem:[#allocation4 + $0x48] sm:$0xff]  ;;  %v122_v56 = vadd.f32 %v121_v47, %v69_v27 }
  0x45   :  { %934 = vmatpush1.bf16.msra.mxu0 %v1218_v31  ;;  %894 = vmatprep.subr.bf16.mxu1 %v1219_v32  ;;  %v71_v31 = vld [vmem:[#allocation4 + $0x50] sm:$0xff]  ;;  %v77_v32 = vrot.slane %v76_v18, 1  ;;  %v127_v48 = vrot.slane %v70_v30, 4 }
  0x46   :  { %935 = vmatprep.subr.bf16.mxu0 %v1222_v33  ;;  %v100_v33 = vadd.f32 %v99_v14, %v98_v3  ;;  %v133_v52 = vrot.slane %v71_v31, 4  ;;  %v123_v2 = vrot.slane %v122_v56, 2 }
  0x47   :  { %v78_v50 = vadd.f32 %v77_v32, %v76_v18  ;;  %v128_v57 = vadd.f32 %v127_v48, %v70_v30 }
  0x48   :  { %895 = vmatpush1.bf16.msra.mxu1 %v1221_v34  ;;  %v118_v34 = vadd.f32 %v117_v26, %v116_v15  ;;  %v101_v51 = vrot.slane %v100_v33, 1  ;;  %v134_v60 = vadd.f32 %v133_v52, %v71_v31  ;;  %v1270_v26 = vld [vmem:[#allocation6 + $0x1f4] ss:$8 sps:$4 sm:$0xff]  }
  0x49   :  { %936 = vmatpush1.bf16.msra.mxu0 %v1224_v35  ;;  %896 = vmatprep.subr.bf16.mxu1 %v1225_v36  ;;  %v1254_v35 = vld [vmem:[#allocation6 + $0x1c0] ss:$8 sps:$4 sm:$0xff]   ;;  %v72_v36 = vld [vmem:[#allocation4 + $0x58] sm:$0xff]  ;;  %v129_v3 = vrot.slane %v128_v57, 2 }
  0x4a   :  { %937 = vmatprep.subr.bf16.mxu0 %v1228_v37  ;;  %v83_v37 = vrot.slane %v82_v19, 1  ;;  %v119_v46 = vrot.slane %v118_v34, 1  ;;  %v139_v53 = vrot.slane %v72_v36, 4  ;;  %v135_v6 = vrot.slane %v134_v60, 2 }
  0x4b   :  { %v102_v9 = vadd.f32 %v101_v51, %v100_v33  ;;  %v1269_v33 = vld [vmem:[#allocation6 + $0xf0] ss:$8 sps:$4 sm:$0xff]  }
  0x4c   :  { %897 = vmatpush1.bf16.msra.mxu1 %v1227_v38  ;;  %v106_v38 = vadd.f32 %v105_v20, %v104_v8  ;;  %v84_v54 = vadd.f32 %v83_v37, %v82_v19  ;;  %v140_v61 = vadd.f32 %v139_v53, %v72_v36  ;;  %v120_v1 = vadd.f32 %v119_v46, %v118_v34  ;;  %v1264_v8 = vld [vmem:[#allocation6 + $0x1e4] ss:$8 sps:$4 sm:$0xff]   ;;  %v1272_v37 = vld [vmem:[#allocation6 + $0x1f0] ss:$8 sps:$4 sm:$0xff]  }
  0x4d   :  { %938 = vmatpush1.bf16.msra.mxu0 %v1230_v39  ;;  %898 = vmatprep.subr.bf16.mxu1 %v1231_v40  ;;  %v1255_v39 = vld [vmem:[#allocation6 + $0xd4] ss:$8 sps:$4 sm:$0xff]   ;;  %v1381_v40 = vmov 1983009808   ;;  %v136_v13 = vadd.f32 %v135_v6, %v134_v60 }
  0x4e   :  { %939 = vmatprep.subr.bf16.mxu0 %v1234_v42  ;;  %v1448_v42 = vshrl.u32 %v162_v23, 7  ;;  %v107_v55 = vrot.slane %v106_v38, 1  ;;  %v141_v7 = vrot.slane %v140_v61, 2  ;;  %v157_v15 = vcombine.low %v78_v50, %v84_v54 }
  0x50   :  { %899 = vmatpush1.bf16.msra.mxu1 %v1233_v41  ;;  %v160_v41 = vunpack.c.l.s4 %v1381_v40  ;;  %v108_v12 = vadd.f32 %v107_v55, %v106_v38  ;;  %v142_v14 = vadd.f32 %v141_v7, %v140_v61 }
  0x51   :  { %940 = vmatpush1.bf16.msra.mxu0 %v1236_v43  ;;  %900 = vmatprep.subr.bf16.mxu1 %v1237_v44  ;;  %v89_v43 = vrot.slane %v88_v24, 1  ;;  %v95_v44 = vrot.slane %v94_v25, 1 }
  0x52   :  { %941 = vmatprep.subr.bf16.mxu0 %v1240_v45  ;;  %v113_v45 = vrot.slane %v112_v28, 1  ;;  %v174_v32 = vcombine.low %v102_v9, %v108_v12 }
  0x53   :  { %v90_v58 = vadd.f32 %v89_v43, %v88_v24  ;;  %v96_v59 = vadd.f32 %v95_v44, %v94_v25  ;;  %v137_v24 = vrot.slane %v136_v13, 1  ;;  %v143_v25 = vrot.slane %v142_v14, 1 }
  0x54   :  { %901 = vmatpush1.bf16.msra.mxu1 %v1239_v63  ;;  %v1260_v63 = vld [vmem:[#allocation6 + $0x1d0] ss:$8 sps:$4 sm:$0xff]  }
  0x55   :  { %942 = vmatpush1.bf16.msra.mxu0 %v1242_v0  ;;  %902 = vmatprep.subr.bf16.mxu1 %v1243_v5  ;;  %v114_v0 = vadd.f32 %v113_v45, %v112_v28  ;;  %v161_v5 = vunpack.c.0.s8 %v160_v41  ;;  %v158_v20 = vcombine.low %v90_v58, %v96_v59  ;;  %v144_v30 = vadd.f32 %v143_v25, %v142_v14  ;;  %v1288_v25 = vld [vmem:[#allocation6 + $0x250] ss:$8 sps:$4 sm:$0xff]  }
  0x56   :  { %943 = vmatprep.subr.bf16.mxu0 %v1246_v11  ;;  %v130_v11 = vadd.f32 %v129_v3, %v128_v57  ;;  %v1382_v58 = vmov 269488144  }
  0x57   :  { %v182_v21 = vcombine.low %v114_v0, %v120_v1  ;;  %v164_v23 = vsub.s32 %v161_v5, %v1448_v42  ;;  %v244_v59 = vunpack.c.l.s4 %v1382_v58 }
  0x58   :  { %903 = vmatpush1.bf16.msra.mxu1 %v1245_v10  ;;  %v124_v10 = vadd.f32 %v123_v2, %v122_v56  ;;  %v131_v19 = vrot.slane %v130_v11, 1 }
  0x59   :  { %944 = vmatpush1.bf16.msra.mxu0 %v1248_v16  ;;  %904 = vmatprep.subr.bf16.mxu1 %v1249_v17  ;;  %v1263_v16 = vld [vmem:[#allocation6 + $0xe0] ss:$8 sps:$4 sm:$0xff]   ;;  %v165_v31 = vrot.slane %v157_v15, %v164_v23  ;;  %v172_v34 = vrot.slane %v158_v20, %v164_v23  ;;  %v190_v36 = vrot.slane %v182_v21, %v164_v23  ;;  %v245_v60 = vunpack.c.0.s8 %v244_v59  ;;  %v1278_v15 = vld [vmem:[#allocation6 + $0x214] ss:$8 sps:$4 sm:$0xff]   ;;  %v1282_v21 = vld [vmem:[#allocation6 + $0x230] ss:$8 sps:$4 sm:$0xff]  }
  0x5a   :  { %945 = vmatprep.subr.bf16.mxu0 %v1252_v22  ;;  %v1266_v17 = vld [vmem:[#allocation6 + $0x1e0] ss:$8 sps:$4 sm:$0xff]   ;;  %v125_v18 = vrot.slane %v124_v10, 1  ;;  %v1267_v22 = vld [vmem:[#allocation6 + $0xf4] ss:$8 sps:$4 sm:$0xff]   ;;  %v132_v28 = vadd.f32 %v131_v19, %v130_v11  ;;  %v181_v41 = vrot.slane %v174_v32, %v164_v23 }
  0x5b   :  { %v173_v44 = vcombine.low %v165_v31, %v172_v34  ;;  %v248_v61 = vsub.s32 %v245_v60, %v1448_v42  ;;  %v1279_v19 = vld [vmem:[#allocation6 + $0x220] ss:$8 sps:$4 sm:$0xff]   ;;  %v1284_v20 = vld [vmem:[#allocation6 + $0x234] ss:$8 sps:$4 sm:$0xff]   ;;  %v1305_v34 = vld [vmem:[#allocation6 + $0x2a4] ss:$8 sps:$4 sm:$0xff]  }
  0x5c   :  { %905 = vmatpush1.bf16.msra.mxu1 %v1251_v29  ;;  %v126_v27 = vadd.f32 %v125_v18, %v124_v10  ;;  %v138_v29 = vadd.f32 %v137_v24, %v136_v13  ;;  %v1273_v13 = vld [vmem:[#allocation6 + $0x200] ss:$8 sps:$4 sm:$0xff]   ;;  %v1281_v18 = vld [vmem:[#allocation6 + $0x224] ss:$8 sps:$4 sm:$0xff]   ;;  %v1290_v24 = vld [vmem:[#allocation6 + $0x254] ss:$8 sps:$4 sm:$0xff]  }
  0x5d   :  { %946 = vmatpush1.bf16.msra.mxu0 %v1254_v35  ;;  %906 = vmatprep.subr.bf16.mxu1 %v1255_v39  ;;  %v1275_v39 = vld [vmem:[#allocation6 + $0x204] ss:$8 sps:$4 sm:$0xff]   ;;  %v1297_v31 = vld [vmem:[#allocation6 + $0x280] ss:$8 sps:$4 sm:$0xff]   ;;  %v1302_v32 = vld [vmem:[#allocation6 + $0x294] ss:$8 sps:$4 sm:$0xff]  }
  0x5e   :  { %947 = vmatprep.subr.bf16.mxu0 %v1258_v49  ;;  %v183_v35 = vcombine.low %v126_v27, %v132_v28  ;;  %v199_v38 = vcombine.low %v138_v29, %v144_v30  ;;  %v60_v49 = vld [vmem:[#allocation2 + $0x8] sm:$0xf]  ;;  %v1291_v27 = vld [vmem:[#allocation6 + $0x260] ss:$8 sps:$4 sm:$0xff]   ;;  %v1299_v30 = vld [vmem:[#allocation6 + $0x284] ss:$8 sps:$4 sm:$0xff]  }
  0x5f   :  { %v1296_v28 = vld [vmem:[#allocation6 + $0x274] ss:$8 sps:$4 sm:$0xff]   ;;  %v1294_v29 = vld [vmem:[#allocation6 + $0x270] ss:$8 sps:$4 sm:$0xff]  }
  0x60   :  { %907 = vmatpush1.bf16.msra.mxu1 %v1257_v62  ;;  %v197_v40 = vrot.slane %v183_v35, %v164_v23  ;;  %v206_v43 = vrot.slane %v199_v38, %v164_v23  ;;  %v1303_v35 = vld [vmem:[#allocation6 + $0x2a0] ss:$8 sps:$4 sm:$0xff]   ;;  %v1311_v38 = vld [vmem:[#allocation6 + $0x2c4] ss:$8 sps:$4 sm:$0xff]  }
  0x61   :  { %948 = vmatpush1.bf16.msra.mxu0 %v1260_v63  ;;  %908 = vmatprep.subr.bf16.mxu1 %v1261_v4 }
  0x62   :  { %949 = vmatprep.subr.bf16.mxu0 %v1264_v8  ;;  %v198_v45 = vcombine.low %v190_v36, %v197_v40  ;;  %v222_v46 = vrot.slane %v206_v43, 7  ;;  %v1308_v36 = vld [vmem:[#allocation6 + $0x2b4] ss:$8 sps:$4 sm:$0xff]   ;;  %v1317_v43 = vld [vmem:[#allocation6 + $0x2e4] ss:$8 sps:$4 sm:$0xff]  }
  0x63   :  { %v1314_v40 = vld [vmem:[#allocation6 + $0x2d4] ss:$8 sps:$4 sm:$0xff]  }
  0x64   :  { %909 = vmatpush1.bf16.msra.mxu1 %v1263_v16  ;;  %v211_v47 = vrot.slane %v198_v45, 7  ;;  %v223_v48 = vsel %vm212_vm0, %v222_v46, %v181_v41  ;;  %v1312_v41 = vld [vmem:[#allocation6 + $0x2d0] ss:$8 sps:$4 sm:$0xff]   ;;  %v1320_v45 = vld [vmem:[#allocation6 + $0x2f4] ss:$8 sps:$4 sm:$0xff]  }
  0x65   :  { %950 = vmatpush1.bf16.msra.mxu0 %v1266_v17  ;;  %910 = vmatprep.subr.bf16.mxu1 %v1267_v22  ;;  %v224_v51 = vsel %vm214_vm1, %v222_v46, %v223_v48  ;;  %v1276_v17 = vld [vmem:[#allocation6 + $0x210] ss:$8 sps:$4 sm:$0xff]   ;;  %v1287_v22 = vld [vmem:[#allocation6 + $0x244] ss:$8 sps:$4 sm:$0xff]  }
  0x66   :  { %951 = vmatprep.subr.bf16.mxu0 %v1270_v26  ;;  %v213_v50 = vsel %vm212_vm0, %v211_v47, %v173_v44  ;;  %v225_v53 = vsel %vm216_vm2, %v222_v46, %v224_v51  ;;  %v1293_v26 = vld [vmem:[#allocation6 + $0x264] ss:$8 sps:$4 sm:$0xff]   ;;  %v1315_v44 = vld [vmem:[#allocation6 + $0x2e0] ss:$8 sps:$4 sm:$0xff]  }
  0x67   :  { %v215_v52 = vsel %vm214_vm1, %v211_v47, %v213_v50  ;;  %v226_v55 = vsel %vm218_vm3, %v222_v46, %v225_v53  ;;  %v1318_v46 = vld [vmem:[#allocation6 + $0x2f0] ss:$8 sps:$4 sm:$0xff]   ;;  %v392_v53 = vsub.s32 0, %v1448_v42 }
  0x68   :  { %911 = vmatpush1.bf16.msra.mxu1 %v1269_v33  ;;  %v217_v54 = vsel %vm216_vm2, %v211_v47, %v215_v52  ;;  %v230_v57 = vadd.f32 %v226_v55, %v60_v49  ;;  %v1300_v33 = vld [vmem:[#allocation6 + $0x290] ss:$8 sps:$4 sm:$0xff]   ;;  %v396_v55 = vsub.s32 1, %v1448_v42 }
  0x69   :  { %952 = vmatpush1.bf16.msra.mxu0 %v1272_v37  ;;  %v219_v56 = vsel %vm218_vm3, %v211_v47, %v217_v54  ;;  %v1306_v37 = vld [vmem:[#allocation6 + $0x2b0] ss:$8 sps:$4 sm:$0xff]  }
  0x6a   :  { %962 = vmatprep.subr.bf16.mxu0 %v1275_v39  ;;  %232 = vst [vmem:[#allocation2 + $0x8] sm:$0xf] %v230_v57  ;;  %v1309_v39 = vld [vmem:[#allocation6 + $0x2c0] ss:$8 sps:$4 sm:$0xff]   ;;  %v1005_v52 = vld [vmem:[%s1474_s4] sm:$0x3] }
  0x6b   :  { %v349_v54 = vld [vmem:[%s1473_s3] sm:$0x3]  ;;  %v1015_v57 = vsub.s32 2, %v1448_v42 }
  0x6c   :  { %v393_v58 = vrot.slane %v349_v54, %v392_v53  ;;  %v397_v59 = vrot.slane %v349_v54, %v396_v55 }
  0x71   :  { %v237_v63 = vld [vmem:[#allocation2 + $0x8] sm:$0xf] }
  0xaa   :  { %v242_v62 = vpop.permute.xlu0 %241 }
  0xab   :  { %v249_v0 = vrot.slane %v242_v62, %v248_v61 }
  0xad   :  { %v251_v1 = vmul.f32 %v249_v0, %v219_v56  ;;  %v252_v2 = vmul.f32 %v249_v0, %v237_v63  ;;  %v1006_v56 = vunpack.c.l.bf16 %v1005_v52 }
  0xaf   :  { %v1452_v3 = vrot.slane %v252_v2, %v164_v23  ;;  %v359_v4 = vrot.slane %v251_v1, %v164_v23  ;;  %v352_v5 = vcombine.high %v251_v1, %v251_v1  ;;  %v1012_v60 = vrot.slane %v1006_v56, %v392_v53 }
  0xb0   :  { %v1016_v61 = vrot.slane %v1006_v56, %v1015_v57 }
  0xb1   :  { %v367_v6 = vcombine.high %v359_v4, %v359_v4  ;;  %v366_v7 = vrot.slane %v352_v5, %v164_v23  ;;  %v376_v10 = vcombine.high %v1452_v3, %v1452_v3  ;;  %v383_v11 = vpack.c.bf16 %v359_v4, %v359_v4  ;;  %v1285_v23 = vld [vmem:[#allocation6 + $0x240] ss:$8 sps:$4 sm:$0xff]  }
  0xb2   :  { %v387_v47 = vpack.c.bf16 %v1452_v3, %v1452_v3  ;;  %v1022_v2 = vrot.slane %v1012_v60, %v392_v53  ;;  %v1026_v5 = vrot.slane %v1016_v61, %v392_v53 }
  0xb3   :  { %v384_v8 = vpack.c.bf16 %v367_v6, %v367_v6  ;;  %v368_v9 = vcombine.high %v366_v7, %v366_v7  ;;  %v385_v14 = vpack.c.bf16 %v366_v7, %v366_v7  ;;  %v388_v16 = vpack.c.bf16 %v376_v10, %v376_v10 }
  0xb5   :  { %912 = vmatprep.mubr.bf16.mxu1 %v384_v8  ;;  %v386_v12 = vpack.c.bf16 %v368_v9, %v368_v9 }
  0xb6   :  { %913 = vmatmul.mubr.bf16.vlgmr.msra.gmra.mrb[0].mxu1 %v383_v11 }
  0xb7   :  { %953 = vmatprep.mubr.bf16.mxu0 %v386_v12 }
  0xb8   :  { %954 = vmatmul.mubr.bf16.vlgmr.msra.gmra.mrb[0].mxu0 %v385_v14  ;;  %v1156_v14 = vld [vmem:[#allocation3] ss:$0 sm:$0xff] }
  0xb9   :  { %963 = vmatpush1.bf16.msra.mxu0 %v1273_v13  ;;  %994 = vmatprep.mubr.bf16.mxu0 %v388_v16 }
  0xba   :  { %964 = vmatprep.subr.bf16.mxu0 %v1278_v15 }
  0xbd   :  { %965 = vmatpush1.bf16.msra.mxu0 %v1276_v17 }
  0xbe   :  { %966 = vmatprep.subr.bf16.mxu0 %v1281_v18 }
  0xc1   :  { %967 = vmatpush1.bf16.msra.mxu0 %v1279_v19 }
  0xc2   :  { %968 = vmatprep.subr.bf16.mxu0 %v1284_v20 }
  0xc5   :  { %969 = vmatpush1.bf16.msra.mxu0 %v1282_v21 }
  0xc6   :  { %970 = vmatprep.subr.bf16.mxu0 %v1287_v22 }
  0xc9   :  { %971 = vmatpush1.bf16.msra.mxu0 %v1285_v23 }
  0xca   :  { %972 = vmatprep.subr.bf16.mxu0 %v1290_v24 }
  0xcd   :  { %973 = vmatpush1.bf16.msra.mxu0 %v1288_v25 }
  0xce   :  { %974 = vmatprep.subr.bf16.mxu0 %v1293_v26 }
  0xd1   :  { %975 = vmatpush1.bf16.msra.mxu0 %v1291_v27 }
  0xd2   :  { %976 = vmatprep.subr.bf16.mxu0 %v1296_v28 }
  0xd5   :  { %977 = vmatpush1.bf16.msra.mxu0 %v1294_v29 }
  0xd6   :  { %978 = vmatprep.subr.bf16.mxu0 %v1299_v30 }
  0xd9   :  { %979 = vmatpush1.bf16.msra.mxu0 %v1297_v31 }
  0xda   :  { %980 = vmatprep.subr.bf16.mxu0 %v1302_v32 }
  0xdd   :  { %981 = vmatpush1.bf16.msra.mxu0 %v1300_v33 }
  0xde   :  { %982 = vmatprep.subr.bf16.mxu0 %v1305_v34 }
  0xe1   :  { %983 = vmatpush1.bf16.msra.mxu0 %v1303_v35 }
  0xe2   :  { %984 = vmatprep.subr.bf16.mxu0 %v1308_v36 }
  0xe5   :  { %985 = vmatpush1.bf16.msra.mxu0 %v1306_v37 }
  0xe6   :  { %986 = vmatprep.subr.bf16.mxu0 %v1311_v38 }
  0xe9   :  { %987 = vmatpush1.bf16.msra.mxu0 %v1309_v39 }
  0xea   :  { %988 = vmatprep.subr.bf16.mxu0 %v1314_v40 }
  0xed   :  { %989 = vmatpush1.bf16.msra.mxu0 %v1312_v41 }
  0xee   :  { %990 = vmatprep.subr.bf16.mxu0 %v1317_v43 }
  0xf1   :  { %991 = vmatpush1.bf16.msra.mxu0 %v1315_v44 }
  0xf2   :  { %992 = vmatprep.subr.bf16.mxu0 %v1320_v45 }
  0xf5   :  { %993 = vmatpush1.bf16.msra.mxu0 %v1318_v46 }
  0xf8   :  { %995 = vmatmul.mubr.bf16.vlgmr.msra.gmra.mrb[0].mxu0 %v387_v47 }
 0x189   :  { %v914_v48 = vpop.f32.mrb[0].mxu1 }
 0x18a   :  { %v916_v49 = vpop.f32.mrb[1].mxu1  ;;  %v915_v62 = vadd.f32 %v914_v48, %v393_v58 }
 0x18b   :  { %v918_v50 = vpop.f32.mrb[2].mxu1  ;;  %v917_v63 = vadd.f32 %v916_v49, %v397_v59 }
 0x18c   :  { %v919_v51 = vpop.f32.mrb[3].mxu1 }
 0x1cb   :  { %v996_v0 = vpop.f32.mrb[0].mxu0 }
 0x1cc   :  { %v1158_v1 = vadd.f32 %v996_v0, %v915_v62  ;;  %v998_v3 = vpop.f32.mrb[1].mxu0 }
 0x1cd   :  { %v1160_v4 = vadd.f32 %v998_v3, %v917_v63  ;;  %v1000_v6 = vpop.f32.mrb[2].mxu0 }
 0x1ce   :  { %v1003_v7 = vmax.f32 %v1158_v1, 0.0  ;;  %v1001_v8 = vpop.f32.mrb[3].mxu0 }
 0x1cf   :  { %v1004_v9 = vmax.f32 %v1160_v4, 0.0 }
 0x1d0   :  { %v1027_v10 = vmul.f32 %v1022_v2, %v1003_v7 }
 0x1d1   :  { %v1028_v11 = vmul.f32 %v1026_v5, %v1004_v9 }
 0x1d2   :  { %v1030_v42 = vsel %vm1029_vm4, %v1027_v10, 0.0 }
 0x1d3   :  { %v1031_v12 = vsel %vm1029_vm4, %v1028_v11, 0.0 }
 0x1d4   :  { %v1032_v13 = vadd.f32 %v1031_v12, %v1030_v42 }
 0x1d6   :  { %1033 = vadd.xlane.f32.xlu0 %v1032_v13 }
 0x263   :  { %v1034_v15 = vpop.xlane.xlu0 %1033 }
 0x264   :  { %v1041_v16 = vadd.f32 %v1156_v14, %v1034_v15 }
 0x266   :  { %v1042_v17 = vsub.f32 0.0, %v1041_v16 }
 0x268   :  { %v1043_v18 = vmul.f32 1.442695, %v1042_v17 }
 0x26a   :  { %1321 = vpow2.f32 %v1043_v18 }
 0x274   :  { %v1322_v19 = vpop.eup %1321 }
 0x275   :  { %v1045_v20 = vadd.f32 1.0, %v1322_v19 }
 0x277   :  { %1323 = vrcp.f32 %v1045_v20 }
 0x281   :  { %v1324_v21 = vpop.eup %1323 }
 0x282   :  { %1050 = vperm.xlu1 %1176, %v1324_v21  }
 0x301   :  { %v1051_v22 = vpop.permute.xlu1 %1050 }
 0x302   :  { %1053 = vst [vmem:[%s1476_s6] sm:$0x3] %v1051_v22 }
 0x303   :  { %1058 = vsyncpa [#allocation5], 1 }
 0x304   :  { %1059 = vsyncpa [#allocation7], 1 }

</bundles_post_ra>
